<compile_context>
chip_gen: v7x
topology: tpu7x:2x2x1
jax: 0.10.0
libtpu: 0.0.40
codegen_flags: <defaults>
</compile_context>

<pallas_src>
from functools import partial

import jax
import jax.numpy as jnp
from jax.experimental import pallas as pl
from jax.experimental.pallas import tpu as pltpu

_LANES = 128          # lane-dense class-axis granularity
_NEG_BIG = -1e30      # bias of padded classes -> exp underflows to exactly 0
_MAX_TB = 1024        # per-step VMEM ~2-3 MiB -> safe under v7x's smaller VMEM too


def _round_up(x, m):
    return ((x + m - 1) // m) * m


def _mlp_softmax_kernel(x_ref, w1_ref, b1_ref, w2_ref, b2_ref, w3_ref, b3_ref, o_ref):
    # ---- fc1 + relu on the VPU (K=2 contraction: two broadcast FMAs) ----
    # TODO(synk): re-benchmark fc1 as an MXU jnp.dot when TB is large and the kernel
    # becomes VALU/XLU-bound (the MXU is idle during this phase).
    x = x_ref[...]                                           # [TB, 2] f32
    w1 = w1_ref[...]                                         # [2, F]  f32
    h1 = x[:, 0:1] * w1[0:1, :] + x[:, 1:2] * w1[1:2, :] + b1_ref[...]
    h1 = jnp.maximum(h1, 0.0)                                # [TB, F]

    # ---- fc2 + relu (MXU); operand dtype comes from the packed weights ----
    h2 = jnp.dot(h1.astype(w2_ref.dtype), w2_ref[...],
                 preferred_element_type=jnp.float32)
    h2 = jnp.maximum(h2 + b2_ref[...], 0.0)                  # [TB, F]

    # ---- fc3 into a lane-dense padded class axis (MXU) ----
    logits = jnp.dot(h2.astype(w3_ref.dtype), w3_ref[...],
                     preferred_element_type=jnp.float32)
    logits = logits + b3_ref[...]                            # padded lanes get -1e30

    # ---- numerically stable softmax; padded lanes underflow to exactly 0 ----
    m = jnp.max(logits, axis=-1, keepdims=True)
    e = jnp.exp(logits - m)
    denom = jnp.sum(e, axis=-1, keepdims=True)
    # Exact divide: approx reciprocal left row sums off by >1e-3 (correctness fix).
    o_ref[...] = (e / denom).astype(o_ref.dtype)


def pack_params(params, *, matmul_dtype=None):
    """One-time weight packing (call once per model, NOT per forward).

    Pads fc3 to a lane-dense round_up(C, 128) class axis (weight 0 / bias -1e30 for
    padded classes) and optionally casts the fc2/fc3 weight slabs to bf16 for
    single-pass MXU matmuls (only worthwhile for large F)."""
    F = params["w2"].shape[0]
    C = params["w3"].shape[1]
    if matmul_dtype is None:
        matmul_dtype = jnp.bfloat16 if F >= 256 else jnp.float32
    padc = _round_up(C, _LANES)

    w3 = params["w3"].astype(jnp.float32)
    b3 = params["b3"].astype(jnp.float32)
    w3_pad = jnp.zeros((F, padc), jnp.float32).at[:, :C].set(w3)
    b3_pad = jnp.full((1, padc), _NEG_BIG, jnp.float32).at[:, :C].set(b3)

    return {
        "w1": params["w1"].astype(jnp.float32),      # [2, F]  (VPU path stays f32)
        "b1": params["b1"].astype(jnp.float32),      # [1, F]
        "w2": params["w2"].astype(matmul_dtype),     # [F, F]
        "b2": params["b2"].astype(jnp.float32),      # [1, F]
        "w3": w3_pad.astype(matmul_dtype),           # [F, PADC]
        "b3": b3_pad,                                # [1, PADC] f32
    }


@partial(jax.jit, static_argnames=("num_output_classes", "out_dtype"))
def model_bilinear_dep_forward(x, packed, *, num_output_classes,
                               out_dtype=jnp.bfloat16):
    """x: [B, 2]. packed: output of pack_params(). Returns [probs, probs] ([B, C])."""
    w1, b1, w2, b2, w3, b3 = (packed[k] for k in ("w1", "b1", "w2", "b2", "w3", "b3"))
    B = x.shape[0]
    F = w2.shape[0]
    padc = w3.shape[1]
    C = num_output_classes

    # Fixed-size batch tile (multiple of 8, capped), batch padded to a whole number of
    # tiles -> per-grid-step overhead is amortized regardless of B.
    TB = min(_MAX_TB, _round_up(B, 8))
    B_pad = _round_up(B, TB)
    x32 = x.astype(jnp.float32)
    if B_pad != B:
        x32 = jnp.pad(x32, ((0, B_pad - B), (0, 0)))
    grid = (B_pad // TB,)

    out_padded = pl.pallas_call(
        _mlp_softmax_kernel,
        out_shape=jax.ShapeDtypeStruct((B_pad, padc), out_dtype),
        grid=grid,
        in_specs=[
            pl.BlockSpec((TB, 2), lambda i: (i, 0)),        # x: tiled over batch
            pl.BlockSpec((2, F), lambda i: (0, 0)),         # fc1 weight (resident)
            pl.BlockSpec((1, F), lambda i: (0, 0)),         # fc1 bias
            pl.BlockSpec((F, F), lambda i: (0, 0)),         # fc2 weight (resident)
            pl.BlockSpec((1, F), lambda i: (0, 0)),         # fc2 bias
            pl.BlockSpec((F, padc), lambda i: (0, 0)),      # fc3 weight (resident)
            pl.BlockSpec((1, padc), lambda i: (0, 0)),      # fc3 bias
        ],
        out_specs=pl.BlockSpec((TB, padc), lambda i: (i, 0)),
        # TODO(synk): on v7x verify in a trace that the batch axis actually shards
        # across both TensorCores; switch to pltpu.CORE_PARALLEL if it does not.
        compiler_params=pltpu.CompilerParams(
            dimension_semantics=("parallel",)),
    )(x32, w1, b1, w2, b2, w3, b3)

    # Jitted, so this slice fuses with downstream consumers instead of costing a
    # separate HBM pass.  Downstream code that can consume the padded slab should.
    out = out_padded[:B, :C]
    # forward() returns [x, x]
    return [out, out]


def init_params(key, features, num_output_classes):
    """Deterministic init mirroring torch.nn.Linear default (uniform +-1/sqrt(fan_in)).
    Weights are stored transposed: (in_features, out_features)."""
    k1, k2, k3, k4, k5, k6 = jax.random.split(key, 6)

    def uni(k, shape, fan_in):
        bound = 1.0 / jnp.sqrt(jnp.float32(fan_in))
        return jax.random.uniform(k, shape, jnp.float32, -bound, bound)

    return {
        "w1": uni(k1, (2, features), 2),
        "b1": uni(k2, (1, features), 2),
        "w2": uni(k3, (features, features), features),
        "b2": uni(k4, (1, features), features),
        "w3": uni(k5, (features, num_output_classes), features),
        "b3": uni(k6, (1, num_output_classes), features),
    }


def _reference_forward(x, params):
    h1 = jnp.maximum(x @ params["w1"] + params["b1"], 0.0)
    h2 = jnp.maximum(h1 @ params["w2"] + params["b2"], 0.0)
    logits = h2 @ params["w3"] + params["b3"]
    return jax.nn.softmax(logits, axis=1)


if __name__ == "__main__":
    features = 32
    num_output_classes = 4
    batch = 8

    key = jax.random.PRNGKey(0)
    kx, kp = jax.random.split(key)

    x = jax.random.normal(kx, (batch, 2), dtype=jnp.float32)
    params = init_params(kp, features, num_output_classes)
    packed = pack_params(params)   # hoisted out of the per-call path

    out_list = model_bilinear_dep_forward(x, packed,
                                          num_output_classes=num_output_classes)
    jax.block_until_ready(out_list)

    out = out_list[0]
    assert len(out_list) == 2
    assert out.shape == (batch, num_output_classes)

    out32 = out.astype(jnp.float32)

    # softmax rows sum to 1 (exact divide; slack only for the bf16 output rounding)
    row_sums = jnp.sum(out32, axis=1)
    assert jnp.allclose(row_sums, jnp.ones_like(row_sums), atol=5e-3), row_sums

    # matches a plain-XLA f32 reference (bf16 output + MXU rounding well inside tol)
    ref = _reference_forward(x, params)
    assert jnp.allclose(out32, ref, atol=2e-2, rtol=2e-2)

    print("KERNEL_OK")
</pallas_src>

<mosaic_0001>
module attributes {stable_mosaic.version = 11 : i64} {
  func.func @_mlp_softmax_kernel(%arg0: i32, %arg1: memref<8x2xf32, #tpu.memory_space<vmem>>, %arg2: memref<2x32xf32, #tpu.memory_space<vmem>>, %arg3: memref<1x32xf32, #tpu.memory_space<vmem>>, %arg4: memref<32x32xf32, #tpu.memory_space<vmem>>, %arg5: memref<1x32xf32, #tpu.memory_space<vmem>>, %arg6: memref<32x128xf32, #tpu.memory_space<vmem>>, %arg7: memref<1x128xf32, #tpu.memory_space<vmem>>, %arg8: memref<8x128xbf16, #tpu.memory_space<vmem>>) attributes {dimension_semantics = [#tpu.dimension_semantics<parallel>], iteration_bounds = array<i64: 1>, scalar_prefetch = 0 : i64, scratch_operands = 0 : i64, tpu.core_type = #tpu.core_type<tc>, window_params = [{transform_indices = @transform_0, window_bounds = array<i64: 8, 2>}, {pipeline_mode = #tpu.pipeline_mode<synchronous>, transform_indices = @transform_1, window_bounds = array<i64: 2, 32>}, {pipeline_mode = #tpu.pipeline_mode<synchronous>, transform_indices = @transform_2, window_bounds = array<i64: 1, 32>}, {pipeline_mode = #tpu.pipeline_mode<synchronous>, transform_indices = @transform_3, window_bounds = array<i64: 32, 32>}, {pipeline_mode = #tpu.pipeline_mode<synchronous>, transform_indices = @transform_4, window_bounds = array<i64: 1, 32>}, {pipeline_mode = #tpu.pipeline_mode<synchronous>, transform_indices = @transform_5, window_bounds = array<i64: 32, 128>}, {pipeline_mode = #tpu.pipeline_mode<synchronous>, transform_indices = @transform_6, window_bounds = array<i64: 1, 128>}, {transform_indices = @transform_7, window_bounds = array<i64: 8, 128>}]} {
    %c0 = arith.constant 0 : index
    %c0_0 = arith.constant 0 : index
    %0 = vector.load %arg1[%c0, %c0_0] : memref<8x2xf32, #tpu.memory_space<vmem>>, vector<8x2xf32>
    %c0_1 = arith.constant 0 : index
    %c0_2 = arith.constant 0 : index
    %1 = vector.load %arg2[%c0_1, %c0_2] : memref<2x32xf32, #tpu.memory_space<vmem>>, vector<2x32xf32>
    %2 = vector.extract_strided_slice %0 {offsets = [0, 0], sizes = [8, 1], strides = [1, 1]} : vector<8x2xf32> to vector<8x1xf32>
    %3 = vector.extract_strided_slice %1 {offsets = [0, 0], sizes = [1, 32], strides = [1, 1]} : vector<2x32xf32> to vector<1x32xf32>
    %4 = vector.broadcast %2 : vector<8x1xf32> to vector<8x32xf32>
    %5 = vector.broadcast %3 : vector<1x32xf32> to vector<8x32xf32>
    %6 = arith.mulf %4, %5 : vector<8x32xf32>
    %7 = vector.extract_strided_slice %0 {offsets = [0, 1], sizes = [8, 1], strides = [1, 1]} : vector<8x2xf32> to vector<8x1xf32>
    %8 = vector.extract_strided_slice %1 {offsets = [1, 0], sizes = [1, 32], strides = [1, 1]} : vector<2x32xf32> to vector<1x32xf32>
    %9 = vector.broadcast %7 : vector<8x1xf32> to vector<8x32xf32>
    %10 = vector.broadcast %8 : vector<1x32xf32> to vector<8x32xf32>
    %11 = arith.mulf %9, %10 : vector<8x32xf32>
    %12 = arith.addf %6, %11 : vector<8x32xf32>
    %c0_3 = arith.constant 0 : index
    %c0_4 = arith.constant 0 : index
    %13 = vector.load %arg3[%c0_3, %c0_4] : memref<1x32xf32, #tpu.memory_space<vmem>>, vector<1x32xf32>
    %14 = vector.broadcast %13 : vector<1x32xf32> to vector<8x32xf32>
    %15 = arith.addf %12, %14 : vector<8x32xf32>
    %cst = arith.constant 0.000000e+00 : f32
    %16 = vector.broadcast %cst : f32 to vector<8x32xf32>
    %17 = arith.maximumf %15, %16 : vector<8x32xf32>
    %c0_5 = arith.constant 0 : index
    %c0_6 = arith.constant 0 : index
    %18 = vector.load %arg4[%c0_5, %c0_6] : memref<32x32xf32, #tpu.memory_space<vmem>>, vector<32x32xf32>
    %cst_7 = arith.constant dense<0.000000e+00> : vector<8x32xf32>
    %19 = tpu.matmul %17, %18, %cst_7 {dimension_numbers = #tpu.dot_dimension_numbers<[1], [0], [0], [1], [0, 0, 1, 1], [], []>} : vector<8x32xf32>, vector<32x32xf32>, vector<8x32xf32> -> vector<8x32xf32>
    %c0_8 = arith.constant 0 : index
    %c0_9 = arith.constant 0 : index
    %20 = vector.load %arg5[%c0_8, %c0_9] : memref<1x32xf32, #tpu.memory_space<vmem>>, vector<1x32xf32>
    %21 = vector.broadcast %20 : vector<1x32xf32> to vector<8x32xf32>
    %22 = arith.addf %19, %21 : vector<8x32xf32>
    %cst_10 = arith.constant 0.000000e+00 : f32
    %23 = vector.broadcast %cst_10 : f32 to vector<8x32xf32>
    %24 = arith.maximumf %22, %23 : vector<8x32xf32>
    %c0_11 = arith.constant 0 : index
    %c0_12 = arith.constant 0 : index
    %25 = vector.load %arg6[%c0_11, %c0_12] : memref<32x128xf32, #tpu.memory_space<vmem>>, vector<32x128xf32>
    %cst_13 = arith.constant dense<0.000000e+00> : vector<8x128xf32>
    %26 = tpu.matmul %24, %25, %cst_13 {dimension_numbers = #tpu.dot_dimension_numbers<[1], [0], [0], [1], [0, 0, 1, 1], [], []>} : vector<8x32xf32>, vector<32x128xf32>, vector<8x128xf32> -> vector<8x128xf32>
    %c0_14 = arith.constant 0 : index
    %c0_15 = arith.constant 0 : index
    %27 = vector.load %arg7[%c0_14, %c0_15] : memref<1x128xf32, #tpu.memory_space<vmem>>, vector<1x128xf32>
    %28 = vector.broadcast %27 : vector<1x128xf32> to vector<8x128xf32>
    %29 = arith.addf %26, %28 : vector<8x128xf32>
    %cst_16 = arith.constant dense<0xFF800000> : vector<8xf32>
    %30 = vector.multi_reduction <maximumf>, %29, %cst_16 [1] : vector<8x128xf32> to vector<8xf32>
    %31 = vector.shape_cast %30 : vector<8xf32> to vector<8x1xf32>
    %32 = vector.broadcast %31 : vector<8x1xf32> to vector<8x128xf32>
    %33 = arith.subf %29, %32 : vector<8x128xf32>
    %34 = math.exp %33 : vector<8x128xf32>
    %cst_17 = arith.constant dense<0.000000e+00> : vector<8xf32>
    %35 = vector.multi_reduction <add>, %34, %cst_17 [1] : vector<8x128xf32> to vector<8xf32>
    %36 = vector.shape_cast %35 : vector<8xf32> to vector<8x1xf32>
    %37 = vector.broadcast %36 : vector<8x1xf32> to vector<8x128xf32>
    %38 = arith.divf %34, %37 : vector<8x128xf32>
    %39 = arith.truncf %38 : vector<8x128xf32> to vector<8x128xbf16>
    %c0_18 = arith.constant 0 : index
    %c0_19 = arith.constant 0 : index
    %40 = vector.load %arg8[%c0_18, %c0_19] : memref<8x128xbf16, #tpu.memory_space<vmem>>, vector<8x128xbf16>
    tpu.vector_store %arg8[%c0_18, %c0_19], %39 {strides = array<i32>} : memref<8x128xbf16, #tpu.memory_space<vmem>>, vector<8x128xbf16>,
    return
  }
  func.func @transform_0(%arg0: i32) -> (i32, i32) {
    %c0_i32 = arith.constant 0 : i32
    %c0_i32_0 = arith.constant 0 : i32
    return %arg0, %c0_i32 : i32, i32
  }
  func.func @transform_1(%arg0: i32) -> (i32, i32) {
    %c0_i32 = arith.constant 0 : i32
    %c0_i32_0 = arith.constant 0 : i32
    %c0_i32_1 = arith.constant 0 : i32
    return %c0_i32, %c0_i32_0 : i32, i32
  }
  func.func @transform_2(%arg0: i32) -> (i32, i32) {
    %c0_i32 = arith.constant 0 : i32
    %c0_i32_0 = arith.constant 0 : i32
    %c0_i32_1 = arith.constant 0 : i32
    return %c0_i32, %c0_i32_0 : i32, i32
  }
  func.func @transform_3(%arg0: i32) -> (i32, i32) {
    %c0_i32 = arith.constant 0 : i32
    %c0_i32_0 = arith.constant 0 : i32
    %c0_i32_1 = arith.constant 0 : i32
    return %c0_i32, %c0_i32_0 : i32, i32
  }
  func.func @transform_4(%arg0: i32) -> (i32, i32) {
    %c0_i32 = arith.constant 0 : i32
    %c0_i32_0 = arith.constant 0 : i32
    %c0_i32_1 = arith.constant 0 : i32
    return %c0_i32, %c0_i32_0 : i32, i32
  }
  func.func @transform_5(%arg0: i32) -> (i32, i32) {
    %c0_i32 = arith.constant 0 : i32
    %c0_i32_0 = arith.constant 0 : i32
    %c0_i32_1 = arith.constant 0 : i32
    return %c0_i32, %c0_i32_0 : i32, i32
  }
  func.func @transform_6(%arg0: i32) -> (i32, i32) {
    %c0_i32 = arith.constant 0 : i32
    %c0_i32_0 = arith.constant 0 : i32
    %c0_i32_1 = arith.constant 0 : i32
    return %c0_i32, %c0_i32_0 : i32, i32
  }
  func.func @transform_7(%arg0: i32) -> (i32, i32) {
    %c0_i32 = arith.constant 0 : i32
    %c0_i32_0 = arith.constant 0 : i32
    return %arg0, %c0_i32 : i32, i32
  }
}

</mosaic_0001>

<bundles_post_ra>
// kernel: model_bilinear_dep_forward.1
= control target key start
LH: loop header
LB: loop body
LE: loop exit
PB: predicated region body
PF: predicated region fallthrough
CT: control target
= control target key end

     0   :  { %12 = vsyncpa [#allocation3], 0  ;;  %s625_s0 = inlined_call_operand.vmem [shape: f32[8,2], index: 0, kind: input, shape index: {}]   ;;  %s626_s1 = inlined_call_operand.hbm [shape: f32[2,32], index: 1, kind: input, shape index: {}]   ;;  %s627_s2 = inlined_call_operand.hbm [shape: f32[1,32], index: 2, kind: input, shape index: {}]   ;;  %s628_s3 = inlined_call_operand.hbm [shape: f32[32,32], index: 3, kind: input, shape index: {}]   ;;  %s629_s4 = inlined_call_operand.hbm [shape: f32[1,32], index: 4, kind: input, shape index: {}]   ;;  %s630_s5 = inlined_call_operand.vmem [shape: f32[32,128], index: 5, kind: input, shape index: {}]   ;;  %s631_s6 = inlined_call_operand.hbm [shape: f32[1,128], index: 6, kind: input, shape index: {}]   ;;  %s632_s7 = inlined_call_operand.vmem [shape: bf16[8,128], index: 7, kind: output, shape index: {}]  }
   0x1   :  { %13 = vsyncpa [#allocation5], 0 }
   0x2   :  { %14 = vsyncpa [#allocation8], 0  ;;  %s488_s24 = smov [#allocation4]   ;;  %s489_s26 = smov [#allocation7]  }
   0x3   :  { %s33_s25 = sshll.u32 %s488_s24, 4  ;;  %s55_s27 = sshll.u32 %s489_s26, 4  ;;  %s34_s25 = int_to_ptr.vmem [resolvable:$true] %s33_s25  ;;  %s56_s27 = int_to_ptr.vmem [resolvable:$true] %s55_s27 }
   0x4   :  { %s372_s30 = scalar_lea.hbm %s627_s2, 16 }
   0x5   :  { %p373_p0 = scmp.ne.s32.totalorder %s627_s2, %s372_s30  ;;  %p376_p1 = scmp.lt.u32.totalorder %s372_s30, %s627_s2 }
   0x7   :  { %p378_p2 = pnand %p376_p1, %p373_p0 }
   0x9   :  { %381 = shalt.err (!%p378_p2)
}
   0xa   :  { %s382_s12 = scalar_lea.vmem %s34_s25, 16  ;;  %s386_s13 = scalar_lea.vmem %s34_s25, 32 }
   0xb   :  { %p383_p3 = scmp.ne.s32.totalorder %s34_s25, %s382_s12  ;;  %p387_p4 = scmp.lt.s32.totalorder %s34_s25, %s34_s25 }
   0xc   :  { %p388_p5 = scmp.lt.s32.totalorder %s386_s13, %s382_s12 }
   0xe   :  { %p389_p6 = por %p388_p5, %p387_p4 }
  0x10   :  { %p390_p7 = pnand %p389_p6, %p383_p3 }
  0x12   :  { %393 = shalt.err (!%p390_p7)
}
  0x13   :  { %36 = dma.hbm_to_vmem [thread:$0]  %s627_s2, 16, %s34_s25, [#allocation5]  }
  0x14   :  { %s394_s18 = scalar_lea.hbm %s629_s4, 16 }
  0x15   :  { %p395_p8 = scmp.ne.s32.totalorder %s629_s4, %s394_s18  ;;  %p398_p9 = scmp.lt.u32.totalorder %s394_s18, %s629_s4 }
  0x17   :  { %p400_p10 = pnand %p398_p9, %p395_p8 }
  0x19   :  { %403 = shalt.err (!%p400_p10)
}
  0x1a   :  { %s404_s23 = scalar_lea.vmem %s56_s27, 16  ;;  %s408_s24 = scalar_lea.vmem %s56_s27, 32 }
  0x1b   :  { %p405_p11 = scmp.ne.s32.totalorder %s56_s27, %s404_s23  ;;  %p409_p12 = scmp.lt.s32.totalorder %s56_s27, %s56_s27 }
  0x1c   :  { %p410_p13 = scmp.lt.s32.totalorder %s408_s24, %s404_s23 }
  0x1e   :  { %p411_p0 = por %p410_p13, %p409_p12 }
  0x20   :  { %p412_p1 = pnand %p411_p0, %p405_p11 }
  0x22   :  { %415 = shalt.err (!%p412_p1)
}
  0x23   :  { %58 = dma.hbm_to_vmem [thread:$0]  %s629_s4, 16, %s56_s27, [#allocation8]  }
  0x24   :  { %s490_s26 = smov [#allocation2]   ;;  %s491_s29 = smov [#allocation6]  }
  0x25   :  { %s23_s28 = sshll.u32 %s490_s26, 4  ;;  %s42_s30 = sshll.u32 %s491_s29, 4  ;;  %s24_s28 = int_to_ptr.vmem [resolvable:$true] %s23_s28  ;;  %s564_s30 = int_to_ptr.vmem [resolvable:$true] %s42_s30 }
  0x26   :  { %s416_s10 = scalar_lea.hbm %s626_s1, 32 }
  0x27   :  { %p417_p2 = scmp.ne.s32.totalorder %s626_s1, %s416_s10  ;;  %p420_p3 = scmp.lt.u32.totalorder %s416_s10, %s626_s1 }
  0x29   :  { %p422_p4 = pnand %p420_p3, %p417_p2 }
  0x2b   :  { %425 = shalt.err (!%p422_p4)
}
  0x2c   :  { %s426_s4 = scalar_lea.vmem %s24_s28, 32  ;;  %p431_p6 = scmp.lt.s32.totalorder %s24_s28, %s24_s28 }
  0x2d   :  { %p427_p5 = scmp.ne.s32.totalorder %s24_s28, %s426_s4  ;;  %p432_p7 = scmp.lt.s32.totalorder %s426_s4, %s426_s4 }
  0x2f   :  { %p433_p8 = por %p432_p7, %p431_p6 }
  0x31   :  { %p434_p9 = pnand %p433_p8, %p427_p5 }
  0x33   :  { %437 = shalt.err (!%p434_p9)
}
  0x34   :  { %26 = dma.hbm_to_vmem [thread:$0]  %s626_s1, 32, %s24_s28, [#allocation3]  }
  0x35   :  { %s438_s18 = scalar_lea.hbm %s628_s3, 512 }
  0x36   :  { %p439_p10 = scmp.ne.s32.totalorder %s628_s3, %s438_s18  ;;  %p442_p11 = scmp.lt.u32.totalorder %s438_s18, %s628_s3 }
  0x38   :  { %p444_p12 = pnand %p442_p11, %p439_p10 }
  0x3a   :  { %447 = shalt.err (!%p444_p12)
}
  0x3b   :  { %s448_s23 = scalar_lea.vmem %s564_s30, 512  ;;  %p453_p0 = scmp.lt.s32.totalorder %s564_s30, %s564_s30 }
  0x3c   :  { %p449_p13 = scmp.ne.s32.totalorder %s564_s30, %s448_s23  ;;  %p454_p1 = scmp.lt.s32.totalorder %s448_s23, %s448_s23 }
  0x3e   :  { %p455_p2 = por %p454_p1, %p453_p0 }
  0x40   :  { %p456_p3 = pnand %p455_p2, %p449_p13 }
  0x42   :  { %459 = shalt.err (!%p456_p3)
}
  0x43   :  { %s492_s1 = smov 128   ;;  %s493_s24 = smov 8  }
  0x44   :  { %48 = dma.hbm_to_vmem [thread:$0]  %s628_s3, 512, %s564_s30, [#allocation5], %s492_s1, %s492_s1, %s493_s24  }
  0x45   :  { %s494_s26 = smov [#allocation9]   ;;  %s460_s9 = scalar_lea.hbm %s631_s6, 16 }
  0x46   :  { %s67_s28 = sshll.u32 %s494_s26, 4  ;;  %p461_p4 = scmp.ne.s32.totalorder %s631_s6, %s460_s9  ;;  %s68_s28 = int_to_ptr.vmem [resolvable:$true] %s67_s28 }
  0x47   :  { %p464_p5 = scmp.lt.u32.totalorder %s460_s9, %s631_s6 }
  0x49   :  { %p466_p6 = pnand %p464_p5, %p461_p4 }
  0x4b   :  { %469 = shalt.err (!%p466_p6)
}
  0x4c   :  { %s470_s14 = scalar_lea.vmem %s68_s28, 16  ;;  %s474_s3 = scalar_lea.vmem %s68_s28, 32 }
  0x4d   :  { %p471_p7 = scmp.ne.s32.totalorder %s68_s28, %s470_s14  ;;  %p475_p8 = scmp.lt.s32.totalorder %s68_s28, %s68_s28 }
  0x4e   :  { %p476_p9 = scmp.lt.s32.totalorder %s474_s3, %s470_s14 }
  0x50   :  { %p477_p10 = por %p476_p9, %p475_p8 }
  0x52   :  { %p478_p11 = pnand %p477_p10, %p471_p7 }
  0x54   :  { %481 = shalt.err (!%p478_p11)
}
  0x55   :  { %70 = dma.hbm_to_vmem [thread:$0]  %s631_s6, 16, %s68_s28, [#allocation8]  }
  0x56   :  { %482 = dma.done.wait [#allocation3], 32  }
  0x57   :  { %483 = vsyncadd [#allocation3], 4294967264 }
  0x58   :  { %484 = dma.done.wait [#allocation5], 528  }
  0x59   :  { %485 = vsyncadd [#allocation5], 4294966768 }
  0x5a   :  { %486 = dma.done.wait [#allocation8], 32  }
  0x5b   :  { %487 = vsyncadd [#allocation8], 4294967264  ;;  %v495_v0 = vmov 0   ;;  %v86_v1 = vld [vmem:[%s625_s0] sm:$0xff]  ;;  %v118_v3 = vld [vmem:[#allocation6 + $0x8] sm:$0xff]  ;;  %v496_v4 = vmov 1   ;;  %v93_v14 = vlaneseq }
  0x5c   :  { %366 = vset.pattern.permute.xlu0 %v495_v0  ;;  %v117_v2 = vld [vmem:[#allocation6] sm:$0xff]  ;;  %v497_v6 = vmov 0.0|0.0   ;;  %v119_v7 = vld [vmem:[#allocation6 + $0x10] sm:$0xff]  ;;  %v120_v8 = vld [vmem:[#allocation6 + $0x18] sm:$0xff]  ;;  %vm498_vm0 = vmmov 0   ;;  %v499_v10 = vmov 0.0  }
  0x5d   :  { %90 = vperm.xlu0 %366, %v86_v1   ;;  %v343_v5 = vpack.c.bf16 %v118_v3, %v117_v2  ;;  %342 = vmatprep.subr.bf16.mxu0 %v497_v6  ;;  %v346_v9 = vpack.c.bf16 %v120_v8, %v119_v7  ;;  %v203_v11 = vld [vmem:[%s630_s5] sm:$0xff]  ;;  %v204_v12 = vld [vmem:[%s630_s5 + $0x8] sm:$0xff]  ;;  %v94_v15 = vshrl.u32 %v93_v14, 7  ;;  %vm128_vm1 = vcmask 261120   ;;  %v205_v29 = vld [vmem:[%s630_s5 + $0x10] sm:$0xff] }
  0x5e   :  { %348 = vmatprep.subr.bf16.mxu1 %v497_v6  ;;  %328 = vmatprep.mubr.msk.f32.mxu0 %vm498_vm0, %v499_v10  ;;  %v349_v13 = vpack.c.bf16 %v204_v12, %v203_v11  ;;  %v87_v18 = vld [vmem:[#allocation2] sm:$0x3]  ;;  %v305_v25 = vld [vmem:[#allocation4] ss:$0 sm:$0xff]  ;;  %v206_v30 = vld [vmem:[%s630_s5 + $0x18] sm:$0xff] }
  0x5f   :  { %344 = vmatpush3.bf16.msra.mxu0 %v343_v5  ;;  %339 = vmatprep.mubr.msk.f32.mxu1 %vm498_vm0, %v499_v10  ;;  %v95_v16 = vsub.s32 0, %v94_v15  ;;  %v104_v17 = vsub.s32 1, %v94_v15  ;;  %v352_v31 = vpack.c.bf16 %v206_v30, %v205_v29  ;;  %v306_v32 = vld [vmem:[#allocation7] ss:$0 sm:$0xff]  ;;  %v308_v37 = vld [vmem:[#allocation9] ss:$0 sm:$0xff] }
  0x60   :  { %345 = vmatprep.subr.bf16.mxu0 %v497_v6  ;;  %350 = vmatpush3.bf16.msra.mxu1 %v349_v13 }
  0x61   :  { %367 = vset.pattern.permute.xlu0 %v496_v4  ;;  %351 = vmatprep.subr.bf16.mxu1 %v497_v6  ;;  %v96_v20 = vrot.slane %v87_v18, %v95_v16  ;;  %v105_v21 = vrot.slane %v87_v18, %v104_v17 }
  0x62   :  { %99 = vperm.xlu0 %367, %v86_v1  }
  0x63   :  { %347 = vmatpush3.bf16.msra.mxu0 %v346_v9 }
  0x64   :  { %353 = vmatpush3.bf16.msra.mxu1 %v352_v31 }
  0xdc   :  { %v91_v19 = vpop.permute.xlu0 %90 }
  0xdd   :  { %v97_v23 = vmul.f32 %v96_v20, %v91_v19 }
  0xe1   :  { %v100_v22 = vpop.permute.xlu0 %99 }
  0xe2   :  { %v106_v24 = vmul.f32 %v105_v21, %v100_v22 }
  0xe4   :  { %v107_v26 = vadd.f32 %v106_v24, %v97_v23 }
  0xe6   :  { %v115_v27 = vadd.f32 %v305_v25, %v107_v26 }
  0xe8   :  { %v116_v28 = vmax.f32 %v115_v27, 0.0 }
  0xea   :  { %329 = vmatmul.mubr.msk.f32.vlgmr.msra.gmra.mrb[0].mxu0 %vm128_vm1, %v116_v28 }
 0x1bd   :  { %v198_v33 = vpop.f32.mrb[0].mxu0 }
 0x1be   :  { %v199_v34 = vadd.f32 %v306_v32, %v198_v33  ;;  %v330_v35 = vpop.f32.mrb[1].mxu0 }
 0x1c0   :  { %v202_v36 = vmax.f32 %v199_v34, 0.0 }
 0x1c2   :  { %340 = vmatmul.mubr.msk.f32.vlgmr.msra.gmra.mrb[0].mxu1 %vm128_vm1, %v202_v36 }
 0x295   :  { %v283_v38 = vpop.f32.mrb[0].mxu1 }
 0x296   :  { %v284_v39 = vadd.f32 %v308_v37, %v283_v38  ;;  %v341_v40 = vpop.f32.mrb[1].mxu1 }
 0x298   :  { %287 = vmax.xlane.f32.xlu1 %v284_v39 }
 0x325   :  { %v288_v41 = vpop.xlane.xlu1 %287 }
 0x326   :  { %v289_v42 = vsub.f32 %v284_v39, %v288_v41 }
 0x328   :  { %v290_v43 = vmul.f32 1.442695, %v289_v42 }
 0x32a   :  { %368 = vpow2.f32 %v290_v43 }
 0x334   :  { %v369_v44 = vpop.eup %368 }
 0x335   :  { %292 = vadd.xlane.f32.xlu1 %v369_v44 }
 0x3c2   :  { %v293_v45 = vpop.xlane.xlu1 %292 }
 0x3c3   :  { %370 = vrcp.f32 %v293_v45 }
 0x3cd   :  { %v371_v46 = vpop.eup %370 }
 0x3ce   :  { %v295_v47 = vmul.f32 %v371_v46, %v369_v44 }
 0x3d0   :  { %v296_v48 = vpack.c.bf16 %v295_v47, %v295_v47 }
 0x3d2   :  { %297 = vst [vmem:[%s632_s7] sm:$0xf] %v296_v48 }
 0x3d3   :  { %302 = vsyncpa [#allocation3], 1 }
 0x3d4   :  { %303 = vsyncpa [#allocation5], 1 }
 0x3d5   :  { %304 = vsyncpa [#allocation8], 1 }

</bundles_post_ra>
